<compile_context>
chip_gen: v5e
topology: v5e:2x2
jax: 0.10.0
libtpu: 0.0.40
codegen_flags: <defaults>
</compile_context>

<pallas_src>
import functools

import jax
import jax.numpy as jnp
from jax.experimental import pallas as pl
from jax.experimental.pallas import tpu as pltpu

_VMEM_LIMIT = 48 * 1024 * 1024  # <= v7x 64 MiB; tiles below use only a few MiB


# ----------------------------------------------------------------------------
# helpers
# ----------------------------------------------------------------------------
def _round_up(x, m):
    return ((x + m - 1) // m) * m


def _choose(dim, pref, align):
    """Pick (tile, padded_dim). Single full block if dim <= pref (legal even if
    unaligned, since block == full array dim); otherwise tile=pref (a multiple
    of align) and pad the dim to a multiple of it."""
    if dim <= pref:
        return dim, dim
    return pref, _round_up(dim, pref)


def _pad2(a, rows, cols):
    pr, pc = rows - a.shape[0], cols - a.shape[1]
    if pr == 0 and pc == 0:
        return a
    return jnp.pad(a, ((0, pr), (0, pc)))


def _pad_rows(a, rows):
    pr = rows - a.shape[0]
    if pr == 0:
        return a
    return jnp.pad(a, ((0, pr), (0, 0)))


def _pad_axis1(a, n):
    p = n - a.shape[1]
    if p == 0:
        return a
    return jnp.pad(a, ((0, 0), (0, p), (0, 0)))


# ----------------------------------------------------------------------------
# Tiled matmul (+ bias, optional ReLU): bf16 HBM I/O, f32 VMEM accumulation
# ----------------------------------------------------------------------------
def _matmul_kernel(x_ref, w_ref, b_ref, o_ref, acc_ref, *, activation):
    k = pl.program_id(2)

    @pl.when(k == 0)
    def _():
        acc_ref[...] = jnp.zeros_like(acc_ref)

    acc_ref[...] += jnp.dot(x_ref[...], w_ref[...],
                            preferred_element_type=jnp.float32)

    @pl.when(k == pl.num_programs(2) - 1)
    def _():
        y = acc_ref[...] + b_ref[...]
        if activation == "relu":
            y = jnp.maximum(y, 0.0)
        o_ref[...] = y.astype(o_ref.dtype)


def pallas_matmul(x, w, b, activation=None):
    """x: (M, K) bf16 @ w: (K, N) bf16 + b: (1, N) f32 -> (M, N) bf16."""
    M, K = x.shape
    N = w.shape[1]
    tm, Mp = _choose(M, 512, 8)
    tn, Np = _choose(N, 256, 128)
    tk, Kp = _choose(K, 512, 128)

    xp = _pad2(x, Mp, Kp)
    wp = _pad2(w, Kp, Np)
    bp = _pad2(b, 1, Np)

    bpx = 2 if x.dtype == jnp.bfloat16 else 4
    grid = (Mp // tm, Np // tn, Kp // tk)
    out = pl.pallas_call(
        functools.partial(_matmul_kernel, activation=activation),
        out_shape=jax.ShapeDtypeStruct((Mp, Np), x.dtype),
        grid=grid,
        in_specs=[
            pl.BlockSpec((tm, tk), lambda i, j, k: (i, k)),
            pl.BlockSpec((tk, tn), lambda i, j, k: (k, j)),
            pl.BlockSpec((1, tn), lambda i, j, k: (0, j)),
        ],
        out_specs=pl.BlockSpec((tm, tn), lambda i, j, k: (i, j)),
        scratch_shapes=[pltpu.VMEM((tm, tn), jnp.float32)],
        compiler_params=pltpu.CompilerParams(
            dimension_semantics=("parallel", "parallel", "arbitrary"),
            vmem_limit_bytes=_VMEM_LIMIT,
        ),
        cost_estimate=pl.CostEstimate(
            flops=int(2 * Mp * Np * Kp),
            transcendentals=0,
            bytes_accessed=int(bpx * (Mp * Kp + Kp * Np + Mp * Np) + 4 * Np),
        ),
    )(xp, wp, bp)
    return out[:M, :N]


# ----------------------------------------------------------------------------
# Flash cross-attention with fused output projection + residual + LayerNorm.
# grid (B, Nq tiles, S tiles); online softmax over S; K and V are column-block
# views of the same concatenated (B, S, 2*D) kv array (no HBM split).
# ----------------------------------------------------------------------------
def _attn_wo_ln_kernel(q_ref, k_ref, v_ref, wo_ref, bo_ref, res_ref, g_ref,
                       b_ref, o_ref, m_ref, l_ref, acc_ref,
                       *, s_valid, ts, masked, eps):
    j = pl.program_id(2)

    @pl.when(j == 0)
    def _():
        m_ref[...] = jnp.full(m_ref.shape, -jnp.inf, jnp.float32)
        l_ref[...] = jnp.zeros_like(l_ref)
        acc_ref[...] = jnp.zeros_like(acc_ref)

    # q already carries the 1/sqrt(D) scale (folded into wq at prep time).
    # Contract the D axes directly (no k.T materialization); bf16 MXU, f32 acc.
    s = jax.lax.dot_general(q_ref[...], k_ref[...], (((1,), (1,)), ((), ())),
                            preferred_element_type=jnp.float32)  # (tq, ts)
    if masked:
        # Only the last S tile actually contains padded columns; the where is
        # a no-op elsewhere and stays off the critical (MXU) path.
        col = jax.lax.broadcasted_iota(jnp.int32, s.shape, 1) + j * ts
        s = jnp.where(col < s_valid, s, -1e30)

    m_prev = m_ref[...]
    m_new = jnp.maximum(m_prev, jnp.max(s, axis=-1, keepdims=True))
    alpha = jnp.exp(m_prev - m_new)
    p = jnp.exp(s - m_new)
    l_ref[...] = alpha * l_ref[...] + jnp.sum(p, axis=-1, keepdims=True)
    acc_ref[...] = alpha * acc_ref[...] + jnp.dot(
        p.astype(jnp.bfloat16), v_ref[...], preferred_element_type=jnp.float32)
    m_ref[...] = m_new

    @pl.when(j == pl.num_programs(2) - 1)
    def _():
        inv_l = pl.reciprocal(l_ref[...], approx=True)
        attn = (acc_ref[...] * inv_l).astype(jnp.bfloat16)
        # Fused epilogue: output projection + residual add + LayerNorm.
        x = jnp.dot(attn, wo_ref[...], preferred_element_type=jnp.float32)
        x = x + bo_ref[...] + res_ref[...].astype(jnp.float32)
        mu = jnp.mean(x, axis=-1, keepdims=True)
        xc = x - mu
        var = jnp.mean(xc * xc, axis=-1, keepdims=True)
        y = xc * jax.lax.rsqrt(var + eps)
        o_ref[...] = (y * g_ref[...] + b_ref[...]).astype(o_ref.dtype)


def pallas_attn_wo_ln(q, kv, wo, bo, resid, gamma, beta, eps=1e-5):
    """q: (B, Nq, D) bf16 (pre-scaled), kv: (B, S, 2D) bf16, resid: (B, Nq, D).
    Returns LayerNorm(resid + Attn(q, K, V) @ wo + bo): (B, Nq, D) bf16."""
    B, Nq, D = q.shape
    S = kv.shape[1]
    tq, Nqp = _choose(Nq, 512, 8)
    ts, Sp = _choose(S, 1024, 8)

    qp = _pad_axis1(q, Nqp)
    rp = _pad_axis1(resid, Nqp)
    kvp = _pad_axis1(kv, Sp)

    kernel = functools.partial(_attn_wo_ln_kernel, s_valid=S, ts=ts,
                               masked=(Sp != S), eps=eps)
    out = pl.pallas_call(
        kernel,
        out_shape=jax.ShapeDtypeStruct((B, Nqp, D), q.dtype),
        grid=(B, Nqp // tq, Sp // ts),
        in_specs=[
            pl.BlockSpec((None, tq, D), lambda b, i, j: (b, i, 0)),   # q
            pl.BlockSpec((None, ts, D), lambda b, i, j: (b, j, 0)),   # K = kv[:, :, :D]
            pl.BlockSpec((None, ts, D), lambda b, i, j: (b, j, 1)),   # V = kv[:, :, D:]
            pl.BlockSpec((D, D), lambda b, i, j: (0, 0)),             # wo (VMEM resident)
            pl.BlockSpec((1, D), lambda b, i, j: (0, 0)),             # bo
            pl.BlockSpec((None, tq, D), lambda b, i, j: (b, i, 0)),   # residual
            pl.BlockSpec((1, D), lambda b, i, j: (0, 0)),             # ln gamma
            pl.BlockSpec((1, D), lambda b, i, j: (0, 0)),             # ln beta
        ],
        out_specs=pl.BlockSpec((None, tq, D), lambda b, i, j: (b, i, 0)),
        scratch_shapes=[
            pltpu.VMEM((tq, 1), jnp.float32),
            pltpu.VMEM((tq, 1), jnp.float32),
            pltpu.VMEM((tq, D), jnp.float32),
        ],
        compiler_params=pltpu.CompilerParams(
            dimension_semantics=("parallel", "parallel", "arbitrary"),
            vmem_limit_bytes=_VMEM_LIMIT,
        ),
        cost_estimate=pl.CostEstimate(
            flops=int(4 * B * Nqp * Sp * D + 2 * B * Nqp * D * D),
            transcendentals=int(B * Nqp * Sp),
            bytes_accessed=int(2 * B * (4 * Nqp * D + 2 * Sp * D) + 2 * D * D),
        ),
    )(qp, kvp, kvp, wo, bo, rp, gamma, beta)
    return out[:, :Nq, :]


# ----------------------------------------------------------------------------
# Fused FFN + residual + LayerNorm:
#   y = LN(x + relu(x @ w1 + b1) @ w2 + b2); the (M, dim_ff) intermediate
#   never touches HBM, and the residual/LN run in the finalize.
# ----------------------------------------------------------------------------
def _ffn_ln_kernel(x_ref, w1_ref, b1_ref, w2_ref, b2_ref, g_ref, b_ref,
                   o_ref, acc_ref, *, eps):
    f = pl.program_id(1)

    @pl.when(f == 0)
    def _():
        acc_ref[...] = jnp.zeros_like(acc_ref)

    h = jnp.dot(x_ref[...], w1_ref[...], preferred_element_type=jnp.float32)
    h = jnp.maximum(h + b1_ref[...], 0.0)
    acc_ref[...] += jnp.dot(h.astype(jnp.bfloat16), w2_ref[...],
                            preferred_element_type=jnp.float32)

    @pl.when(f == pl.num_programs(1) - 1)
    def _():
        # Residual (x block is resident across the F reduction) + LayerNorm.
        x = acc_ref[...] + b2_ref[...] + x_ref[...].astype(jnp.float32)
        mu = jnp.mean(x, axis=-1, keepdims=True)
        xc = x - mu
        var = jnp.mean(xc * xc, axis=-1, keepdims=True)
        y = xc * jax.lax.rsqrt(var + eps)
        o_ref[...] = (y * g_ref[...] + b_ref[...]).astype(o_ref.dtype)


def pallas_ffn_ln(x, w1, b1, w2, b2, gamma, beta, eps=1e-5):
    """x: (M, D) bf16 -> (M, D) bf16."""
    M, D = x.shape
    F = w1.shape[1]
    tm, Mp = _choose(M, 512, 8)
    tf, Fp = _choose(F, 1024, 128)

    xp = _pad_rows(x, Mp)
    w1p = _pad2(w1, D, Fp)
    b1p = _pad2(b1, 1, Fp)
    w2p = _pad2(w2, Fp, D)

    out = pl.pallas_call(
        functools.partial(_ffn_ln_kernel, eps=eps),
        out_shape=jax.ShapeDtypeStruct((Mp, D), x.dtype),
        grid=(Mp // tm, Fp // tf),
        in_specs=[
            pl.BlockSpec((tm, D), lambda i, f: (i, 0)),
            pl.BlockSpec((D, tf), lambda i, f: (0, f)),
            pl.BlockSpec((1, tf), lambda i, f: (0, f)),
            pl.BlockSpec((tf, D), lambda i, f: (f, 0)),
            pl.BlockSpec((1, D), lambda i, f: (0, 0)),
            pl.BlockSpec((1, D), lambda i, f: (0, 0)),
            pl.BlockSpec((1, D), lambda i, f: (0, 0)),
        ],
        out_specs=pl.BlockSpec((tm, D), lambda i, f: (i, 0)),
        scratch_shapes=[pltpu.VMEM((tm, D), jnp.float32)],
        compiler_params=pltpu.CompilerParams(
            dimension_semantics=("parallel", "arbitrary"),
            vmem_limit_bytes=_VMEM_LIMIT,
        ),
        cost_estimate=pl.CostEstimate(
            flops=int(4 * Mp * Fp * D),
            transcendentals=0,
            bytes_accessed=int(2 * (2 * Mp * D + 2 * D * Fp) + 4 * (Fp + 3 * D)),
        ),
    )(xp, w1p, b1p, w2p, b2, gamma, beta)
    return out[:M]


# ----------------------------------------------------------------------------
# Parameters (f32, PyTorch-like) and kernel-ready preparation (bf16, folded)
# ----------------------------------------------------------------------------
def init_params(key, in_channels, d_model, dim_ff, num_layers, num_queries):
    keys = iter(jax.random.split(key, 8 + 16 * num_layers + 2 * len(in_channels)))

    def nrm(shape, scale=0.02):
        return (scale * jax.random.normal(next(keys), shape)).astype(jnp.float32)

    def zeros(shape):
        return jnp.zeros(shape, jnp.float32)

    params = {
        "proj_w": [nrm((c, d_model)) for c in in_channels],   # 1x1 conv weights
        "proj_b": [zeros((1, d_model)) for _ in in_channels],
        "level_embed": nrm((len(in_channels), d_model)),
        "query_embed": nrm((num_queries, d_model)),
        "layers": [],
    }
    for _ in range(num_layers):
        layer = {
            "wq": nrm((d_model, d_model)), "bq": zeros((1, d_model)),
            "wk": nrm((d_model, d_model)), "bk": zeros((1, d_model)),
            "wv": nrm((d_model, d_model)), "bv": zeros((1, d_model)),
            "wo": nrm((d_model, d_model)), "bo": zeros((1, d_model)),
            "ln1_g": jnp.ones((1, d_model), jnp.float32), "ln1_b": zeros((1, d_model)),
            "w1": nrm((d_model, dim_ff)), "b1": zeros((1, dim_ff)),
            "w2": nrm((dim_ff, d_model)), "b2": zeros((1, d_model)),
            "ln2_g": jnp.ones((1, d_model), jnp.float32), "ln2_b": zeros((1, d_model)),
        }
        params["layers"].append(layer)
    return params


def prepare_params(params, d_model):
    """One-time (per weights) prep: bf16 casts, level-embed bias fold,
    softmax-scale fold into wq/bq, and K/V weight concatenation."""
    scale = 1.0 / float(d_model) ** 0.5
    prep = {
        "proj_w": [w.astype(jnp.bfloat16) for w in params["proj_w"]],
        "proj_b": [params["proj_b"][i] + params["level_embed"][i][None, :]
                   for i in range(len(params["proj_w"]))],
        "query_embed": params["query_embed"].astype(jnp.bfloat16),
        "layers": [],
    }
    for layer in params["layers"]:
        prep["layers"].append({
            "wq": (layer["wq"] * scale).astype(jnp.bfloat16),
            "bq": layer["bq"] * scale,
            "wkv": jnp.concatenate([layer["wk"], layer["wv"]], axis=1
                                   ).astype(jnp.bfloat16),
            "bkv": jnp.concatenate([layer["bk"], layer["bv"]], axis=1),
            "wo": layer["wo"].astype(jnp.bfloat16), "bo": layer["bo"],
            "ln1_g": layer["ln1_g"], "ln1_b": layer["ln1_b"],
            "w1": layer["w1"].astype(jnp.bfloat16), "b1": layer["b1"],
            "w2": layer["w2"].astype(jnp.bfloat16), "b2": layer["b2"],
            "ln2_g": layer["ln2_g"], "ln2_b": layer["ln2_b"],
        })
    return prep


# ----------------------------------------------------------------------------
# Simplified DeformTransformer (BEV encoder core)
# ----------------------------------------------------------------------------
def deform_transformer(feats, cameras_info, prep, d_model, bev_hw):
    """feats[i]: (B, C_i, H_i, W_i') channels-first (W' already folds cameras)."""
    del cameras_info  # TODO(synk): extrinsic/intrinsic/do_flip reference-point projection of the true DeformTransformer not reproduced (source not provided).
    B = feats[0].shape[0]
    bev_h, bev_w = bev_hw
    num_queries = bev_h * bev_w

    tokens = []
    for lvl, f in enumerate(feats):
        _, C, H, W = f.shape
        # 1x1 conv input projection == per-pixel linear over channels.
        # Level embedding already folded into the projection bias at prep time.
        x = jnp.transpose(f, (0, 2, 3, 1)).reshape(B * H * W, C).astype(jnp.bfloat16)
        x = pallas_matmul(x, prep["proj_w"][lvl], prep["proj_b"][lvl])
        tokens.append(x.reshape(B, H * W, d_model))
    memory = jnp.concatenate(tokens, axis=1)               # (B, S, d_model) bf16
    S = memory.shape[1]
    mem2d = memory.reshape(B * S, d_model)

    # TODO(synk): true multi-scale deformable attention (sampling offsets +
    # bilinear gather, multi-head) approximated by dense flash cross-attention.
    q = jnp.broadcast_to(prep["query_embed"][None], (B, num_queries, d_model))

    bev_queries = []
    for layer in prep["layers"]:
        q2d = q.reshape(B * num_queries, d_model)
        qq = pallas_matmul(q2d, layer["wq"], layer["bq"]
                           ).reshape(B, num_queries, d_model)
        # Fused K/V projection; its (B, S, 2*D) output is consumed directly by
        # the attention kernel (column-block BlockSpec views), never split.
        kv = pallas_matmul(mem2d, layer["wkv"], layer["bkv"]
                           ).reshape(B, S, 2 * d_model)

        # attention + output proj + residual + LayerNorm, all fused.
        q = pallas_attn_wo_ln(qq, kv, layer["wo"], layer["bo"], q,
                              layer["ln1_g"], layer["ln1_b"])

        # FFN + residual + LayerNorm, fused.
        q2d = pallas_ffn_ln(q.reshape(B * num_queries, d_model),
                            layer["w1"], layer["b1"], layer["w2"], layer["b2"],
                            layer["ln2_g"], layer["ln2_b"])
        q = q2d.reshape(B, num_queries, d_model)
        bev_queries.append(q)

    # Channels stay lane-dense through every kernel; single NCHW transpose per
    # decoder layer here in plain JAX (matches reference output layout).
    bev_feats = [jnp.transpose(bq, (0, 2, 1)).reshape(B, d_model, bev_h, bev_w
                                                      ).astype(jnp.float32)
                 for bq in bev_queries]
    return None, None, bev_feats


# ----------------------------------------------------------------------------
# DeformTransformerBEVEncoder.forward equivalent
# ----------------------------------------------------------------------------
def deform_transformer_bev_encoder(inputs, prep, d_model, bev_hw):
    assert "im_bkb_features" in inputs
    feats = list(inputs["im_bkb_features"])
    B, N_cam = inputs["images"].shape[:2]
    for i in range(len(feats)):
        f = feats[i]
        f = f.reshape(B, N_cam, *f.shape[-3:])      # (B, Ncam, C, H, W)
        f = jnp.transpose(f, (0, 2, 3, 1, 4))       # (B, C, H, Ncam, W)
        f = f.reshape(*f.shape[:3], -1)             # (B, C, H, Ncam*W)
        feats[i] = f
    cameras_info = {
        "extrinsic": inputs.get("extrinsic", None),
        "intrinsic": inputs.get("intrinsic", None),
        "do_flip": inputs["extra_infos"].get("do_flip", None),
    }
    _, _, bev_feats = deform_transformer(feats, cameras_info, prep, d_model, bev_hw)
    return {"bev_enc_features": list(bev_feats)}


# ----------------------------------------------------------------------------
# Demo
# ----------------------------------------------------------------------------
if __name__ == "__main__":
    key = jax.random.PRNGKey(0)
    k_img, k_f0, k_f1, k_ext, k_int, k_par = jax.random.split(key, 6)

    B, N_cam = 2, 2
    in_channels = [8, 16]
    d_model, dim_ff, num_dec_layers = 128, 256, 2   # lane-aligned d_model
    bev_hw = (8, 8)

    inputs = {
        "images": jax.random.normal(k_img, (B, N_cam, 3, 32, 32), jnp.float32),
        "im_bkb_features": [
            jax.random.normal(k_f0, (B * N_cam, in_channels[0], 8, 8), jnp.float32),
            jax.random.normal(k_f1, (B * N_cam, in_channels[1], 4, 4), jnp.float32),
        ],
        "extrinsic": jax.random.normal(k_ext, (B, N_cam, 4, 4), jnp.float32),
        "intrinsic": jax.random.normal(k_int, (B, N_cam, 3, 3), jnp.float32),
        "extra_infos": {"do_flip": False},
    }

    params = init_params(k_par, in_channels, d_model, dim_ff, num_dec_layers,
                         bev_hw[0] * bev_hw[1])
    prep = prepare_params(params, d_model)

    out = deform_transformer_bev_encoder(inputs, prep, d_model, bev_hw)
    for f in out["bev_enc_features"]:
        jax.block_until_ready(f)
        assert f.shape == (B, d_model, bev_hw[0], bev_hw[1])
        assert bool(jnp.all(jnp.isfinite(f)))
    print("KERNEL_OK")
</pallas_src>

<mosaic_0001>
module attributes {stable_mosaic.version = 11 : i64} {
  func.func @_matmul_kernel(%arg0: i32, %arg1: i32, %arg2: i32, %arg3: memref<256x8xbf16, #tpu.memory_space<vmem>>, %arg4: memref<8x128xbf16, #tpu.memory_space<vmem>>, %arg5: memref<1x128xf32, #tpu.memory_space<vmem>>, %arg6: memref<256x128xbf16, #tpu.memory_space<vmem>>, %arg7: memref<256x128xf32, #tpu.memory_space<vmem>>) attributes {dimension_semantics = [#tpu.dimension_semantics<parallel>, #tpu.dimension_semantics<parallel>, #tpu.dimension_semantics<arbitrary>], iteration_bounds = array<i64: 1, 1, 1>, scalar_prefetch = 0 : i64, scratch_operands = 1 : i64, tpu.core_type = #tpu.core_type<tc>, window_params = [{transform_indices = @transform_0, window_bounds = array<i64: 256, 8>}, {transform_indices = @transform_1, window_bounds = array<i64: 8, 128>}, {transform_indices = @transform_2, window_bounds = array<i64: 1, 128>}, {transform_indices = @transform_3, window_bounds = array<i64: 256, 128>}]} {
    %c0_i32 = arith.constant 0 : i32
    %0 = arith.cmpi eq, %arg2, %c0_i32 : i32
    %1 = arith.extui %0 : i1 to i32
    %c0_i32_0 = arith.constant 0 : i32
    %2 = arith.cmpi ne, %1, %c0_i32_0 : i32
    scf.if %2 {
      %cst_10 = arith.constant 0.000000e+00 : f32
      %12 = vector.broadcast %cst_10 : f32 to vector<256x128xf32>
      %c0_11 = arith.constant 0 : index
      %c0_12 = arith.constant 0 : index
      %13 = vector.load %arg7[%c0_11, %c0_12] : memref<256x128xf32, #tpu.memory_space<vmem>>, vector<256x128xf32>
      tpu.vector_store %arg7[%c0_11, %c0_12], %12 {strides = array<i32>} : memref<256x128xf32, #tpu.memory_space<vmem>>, vector<256x128xf32>,
    } else {
    }
    %c0 = arith.constant 0 : index
    %c0_1 = arith.constant 0 : index
    %3 = vector.load %arg7[%c0, %c0_1] : memref<256x128xf32, #tpu.memory_space<vmem>>, vector<256x128xf32>
    %c0_2 = arith.constant 0 : index
    %c0_3 = arith.constant 0 : index
    %4 = vector.load %arg3[%c0_2, %c0_3] : memref<256x8xbf16, #tpu.memory_space<vmem>>, vector<256x8xbf16>
    %c0_4 = arith.constant 0 : index
    %c0_5 = arith.constant 0 : index
    %5 = vector.load %arg4[%c0_4, %c0_5] : memref<8x128xbf16, #tpu.memory_space<vmem>>, vector<8x128xbf16>
    %cst = arith.constant dense<0.000000e+00> : vector<256x128xf32>
    %6 = tpu.matmul %4, %5, %cst {dimension_numbers = #tpu.dot_dimension_numbers<[1], [0], [0], [1], [0, 0, 1, 1], [], []>} : vector<256x8xbf16>, vector<8x128xbf16>, vector<256x128xf32> -> vector<256x128xf32>
    %7 = arith.addf %3, %6 : vector<256x128xf32>
    %c0_6 = arith.constant 0 : index
    %c0_7 = arith.constant 0 : index
    %8 = vector.load %arg7[%c0_6, %c0_7] : memref<256x128xf32, #tpu.memory_space<vmem>>, vector<256x128xf32>
    tpu.vector_store %arg7[%c0_6, %c0_7], %7 {strides = array<i32>} : memref<256x128xf32, #tpu.memory_space<vmem>>, vector<256x128xf32>,
    %c0_i32_8 = arith.constant 0 : i32
    %9 = arith.cmpi eq, %arg2, %c0_i32_8 : i32
    %10 = arith.extui %9 : i1 to i32
    %c0_i32_9 = arith.constant 0 : i32
    %11 = arith.cmpi ne, %10, %c0_i32_9 : i32
    scf.if %11 {
      %c0_10 = arith.constant 0 : index
      %c0_11 = arith.constant 0 : index
      %12 = vector.load %arg7[%c0_10, %c0_11] : memref<256x128xf32, #tpu.memory_space<vmem>>, vector<256x128xf32>
      %c0_12 = arith.constant 0 : index
      %c0_13 = arith.constant 0 : index
      %13 = vector.load %arg5[%c0_12, %c0_13] : memref<1x128xf32, #tpu.memory_space<vmem>>, vector<1x128xf32>
      %14 = vector.broadcast %13 : vector<1x128xf32> to vector<256x128xf32>
      %15 = arith.addf %12, %14 : vector<256x128xf32>
      %16 = arith.truncf %15 : vector<256x128xf32> to vector<256x128xbf16>
      %c0_14 = arith.constant 0 : index
      %c0_15 = arith.constant 0 : index
      %17 = vector.load %arg6[%c0_14, %c0_15] : memref<256x128xbf16, #tpu.memory_space<vmem>>, vector<256x128xbf16>
      tpu.vector_store %arg6[%c0_14, %c0_15], %16 {strides = array<i32>} : memref<256x128xbf16, #tpu.memory_space<vmem>>, vector<256x128xbf16>,
    } else {
    }
    return
  }
  func.func @transform_0(%arg0: i32, %arg1: i32, %arg2: i32) -> (i32, i32) {
    %c0_i32 = arith.constant 0 : i32
    return %arg0, %arg2 : i32, i32
  }
  func.func @transform_1(%arg0: i32, %arg1: i32, %arg2: i32) -> (i32, i32) {
    %c0_i32 = arith.constant 0 : i32
    return %arg2, %arg1 : i32, i32
  }
  func.func @transform_2(%arg0: i32, %arg1: i32, %arg2: i32) -> (i32, i32) {
    %c0_i32 = arith.constant 0 : i32
    %c0_i32_0 = arith.constant 0 : i32
    return %c0_i32, %arg1 : i32, i32
  }
  func.func @transform_3(%arg0: i32, %arg1: i32, %arg2: i32) -> (i32, i32) {
    %c0_i32 = arith.constant 0 : i32
    return %arg0, %arg1 : i32, i32
  }
}

</mosaic_0001>

<bundles_post_ra>
// kernel: tpu_custom_call.1
= control target key start
LH: loop header
LB: loop body
LE: loop exit
PB: predicated region body
PF: predicated region fallthrough
CT: control target
= control target key end

     0   :  { %vm246_vm0 = vcmask 1043456   ;;  %vm197_vm1 = vcmask 64512   ;;  %s910_s0 = inlined_call_operand.vmem [shape: bf16[256,8], index: 0, kind: input, shape index: {}]   ;;  %s911_s1 = inlined_call_operand.vmem [shape: bf16[8,128], index: 1, kind: input, shape index: {}]   ;;  %s912_s2 = inlined_call_operand.vmem [shape: f32[1,128], index: 2, kind: input, shape index: {}]   ;;  %s913_s3 = inlined_call_operand.hbm [shape: bf16[256,128], index: 3, kind: output, shape index: {}]  }
   0x1   :  { %v116_v0 = vld [vmem:[%s911_s1] sm:$0xf] }
   0x2   :  { %v248_v1 = vsel %vm246_vm0, %v116_v0, 0  ;;  %v636_v2 = vld [vmem:[%s910_s0] sm:$0xff] }
   0x3   :  { %v640_v3 = vld [vmem:[%s910_s0 + $0x20] sm:$0xff]  ;;  %257 = vmatpush.bf16.msra.mxu0 %v248_v1  ;;  %747 = vmatpush.bf16.msra.mxu1 %v248_v1 }
   0x4   :  { %v644_v4 = vld [vmem:[%s910_s0 + $0x40] sm:$0xff]  ;;  %748 = vmatpush.bf16.msra.mxu2 %v248_v1  ;;  %749 = vmatpush.bf16.msra.mxu3 %v248_v1 }
   0x5   :  { %v648_v5 = vld [vmem:[%s910_s0 + $0x60] sm:$0xff] }
   0x6   :  { %8 = vsyncpa [#allocation4], 0  ;;  %620 = vmatmul.msk.bf16.vlgmr.msra.gmra.mxu0 %vm197_vm1, %v636_v2  ;;  %624 = vmatmul.msk.bf16.vlgmr.msra.gmra.mxu1 %vm197_vm1, %v640_v3  ;;  %v637_v6 = vld [vmem:[%s910_s0 + $0x8] sm:$0xff]  ;;  %v638_v10 = vld [vmem:[%s910_s0 + $0x10] sm:$0xff]  ;;  %s544_s1 = sshll.u32 %s913_s3, 4  ;;  %s781_s22 = smov 64   ;;  %s545_s1 = int_to_ptr.hbm [resolvable:$true] %s544_s1 }
   0x7   :  { %628 = vmatmul.msk.bf16.vlgmr.msra.gmra.mxu2 %vm197_vm1, %v644_v4  ;;  %632 = vmatmul.msk.bf16.vlgmr.msra.gmra.mxu3 %vm197_vm1, %v648_v5  ;;  %v641_v7 = vld [vmem:[%s910_s0 + $0x28] sm:$0xff]  ;;  %v642_v11 = vld [vmem:[%s910_s0 + $0x30] sm:$0xff]  ;;  %v639_v14 = vld [vmem:[%s910_s0 + $0x18] sm:$0xff]  ;;  %s782_s23 = smov 4  }
   0x8   :  { %v645_v8 = vld [vmem:[%s910_s0 + $0x48] sm:$0xff]  ;;  %v646_v12 = vld [vmem:[%s910_s0 + $0x50] sm:$0xff]  ;;  %v643_v15 = vld [vmem:[%s910_s0 + $0x38] sm:$0xff] }
   0x9   :  { %v649_v9 = vld [vmem:[%s910_s0 + $0x68] sm:$0xff]  ;;  %v650_v13 = vld [vmem:[%s910_s0 + $0x70] sm:$0xff]  ;;  %v647_v16 = vld [vmem:[%s910_s0 + $0x58] sm:$0xff] }
   0xa   :  { %v651_v17 = vld [vmem:[%s910_s0 + $0x78] sm:$0xff]  ;;  %v873_v20 = vld [vmem:[%s912_s2] ss:$0 sm:$0xff]  ;;  %s780_s0 = smov [#allocation3]  }
   0xb   :  { %s542_s2 = sshll.u32 %s780_s0, 4  ;;  %s543_s2 = int_to_ptr.vmem [resolvable:$true] %s542_s2 }
  0x16   :  { %621 = vmatmul.msk.bf16.gmra.mxu0 %vm197_vm1, %v637_v6  ;;  %625 = vmatmul.msk.bf16.gmra.mxu1 %vm197_vm1, %v641_v7 }
  0x17   :  { %629 = vmatmul.msk.bf16.gmra.mxu2 %vm197_vm1, %v645_v8  ;;  %633 = vmatmul.msk.bf16.gmra.mxu3 %vm197_vm1, %v649_v9 }
  0x26   :  { %622 = vmatmul.msk.bf16.gmra.mxu0 %vm197_vm1, %v638_v10  ;;  %626 = vmatmul.msk.bf16.gmra.mxu1 %vm197_vm1, %v642_v11 }
  0x27   :  { %630 = vmatmul.msk.bf16.gmra.mxu2 %vm197_vm1, %v646_v12  ;;  %634 = vmatmul.msk.bf16.gmra.mxu3 %vm197_vm1, %v650_v13 }
  0x36   :  { %623 = vmatmul.msk.bf16.gmra.mxu0 %vm197_vm1, %v639_v14  ;;  %627 = vmatmul.msk.bf16.gmra.mxu1 %vm197_vm1, %v643_v15 }
  0x37   :  { %631 = vmatmul.msk.bf16.gmra.mxu2 %vm197_vm1, %v647_v16  ;;  %635 = vmatmul.msk.bf16.gmra.mxu3 %vm197_vm1, %v651_v17 }
  0x83   :  { %v259_v18 = vpop.f32.mrf.mxu0  ;;  %v279_v19 = vpop.f32.mrf.mxu1 }
  0x84   :  { %v442_v25 = vadd.f32 %v873_v20, %v259_v18  ;;  %v450_v26 = vadd.f32 %v873_v20, %v279_v19 }
  0x8a   :  { %v299_v21 = vpop.f32.mrf.mxu2  ;;  %v319_v22 = vpop.f32.mrf.mxu3 }
  0x8b   :  { %v261_v23 = vpop.f32.mrf.mxu0  ;;  %v281_v24 = vpop.f32.mrf.mxu1  ;;  %v458_v33 = vadd.f32 %v873_v20, %v299_v21  ;;  %v466_v34 = vadd.f32 %v873_v20, %v319_v22 }
  0x8c   :  { %v443_v27 = vadd.f32 %v873_v20, %v261_v23  ;;  %v451_v28 = vadd.f32 %v873_v20, %v281_v24 }
  0x8e   :  { %v655_v29 = vpack.c.bf16 %v443_v27, %v442_v25  ;;  %v675_v30 = vpack.c.bf16 %v451_v28, %v450_v26 }
  0x90   :  { %656 = vst [vmem:[#allocation3] sm:$0xff] %v655_v29  }
  0x91   :  { %735 = vst [vmem:[#allocation3 + $0x20] sm:$0xff] %v675_v30  }
  0x92   :  { %v301_v31 = vpop.f32.mrf.mxu2  ;;  %v321_v32 = vpop.f32.mrf.mxu3 }
  0x93   :  { %v459_v35 = vadd.f32 %v873_v20, %v301_v31  ;;  %v467_v36 = vadd.f32 %v873_v20, %v321_v32  ;;  %v264_v37 = vpop.f32.mrf.mxu0  ;;  %v284_v38 = vpop.f32.mrf.mxu1 }
  0x94   :  { %v444_v45 = vadd.f32 %v873_v20, %v264_v37  ;;  %v452_v46 = vadd.f32 %v873_v20, %v284_v38 }
  0x95   :  { %v695_v39 = vpack.c.bf16 %v459_v35, %v458_v33  ;;  %v715_v40 = vpack.c.bf16 %v467_v36, %v466_v34 }
  0x97   :  { %739 = vst [vmem:[#allocation3 + $0x40] sm:$0xff] %v695_v39  }
  0x98   :  { %743 = vst [vmem:[#allocation3 + $0x60] sm:$0xff] %v715_v40  }
  0x9a   :  { %v304_v41 = vpop.f32.mrf.mxu2  ;;  %v324_v42 = vpop.f32.mrf.mxu3 }
  0x9b   :  { %v266_v43 = vpop.f32.mrf.mxu0  ;;  %v286_v44 = vpop.f32.mrf.mxu1  ;;  %v460_v53 = vadd.f32 %v873_v20, %v304_v41  ;;  %v468_v54 = vadd.f32 %v873_v20, %v324_v42 }
  0x9c   :  { %v445_v47 = vadd.f32 %v873_v20, %v266_v43  ;;  %v453_v48 = vadd.f32 %v873_v20, %v286_v44 }
  0x9e   :  { %v660_v49 = vpack.c.bf16 %v445_v47, %v444_v45  ;;  %v680_v50 = vpack.c.bf16 %v453_v48, %v452_v46 }
  0xa0   :  { %732 = vst [vmem:[#allocation3 + $0x8] sm:$0xff] %v660_v49  }
  0xa1   :  { %736 = vst [vmem:[#allocation3 + $0x28] sm:$0xff] %v680_v50  }
  0xa2   :  { %v306_v51 = vpop.f32.mrf.mxu2  ;;  %v326_v52 = vpop.f32.mrf.mxu3 }
  0xa3   :  { %v461_v55 = vadd.f32 %v873_v20, %v306_v51  ;;  %v469_v56 = vadd.f32 %v873_v20, %v326_v52  ;;  %v269_v57 = vpop.f32.mrf.mxu0  ;;  %v289_v58 = vpop.f32.mrf.mxu1 }
  0xa4   :  { %v446_v1 = vadd.f32 %v873_v20, %v269_v57  ;;  %v454_v2 = vadd.f32 %v873_v20, %v289_v58 }
  0xa5   :  { %v700_v59 = vpack.c.bf16 %v461_v55, %v460_v53  ;;  %v720_v60 = vpack.c.bf16 %v469_v56, %v468_v54 }
  0xa7   :  { %740 = vst [vmem:[#allocation3 + $0x48] sm:$0xff] %v700_v59  }
  0xa8   :  { %744 = vst [vmem:[#allocation3 + $0x68] sm:$0xff] %v720_v60  }
  0xaa   :  { %v309_v61 = vpop.f32.mrf.mxu2  ;;  %v329_v62 = vpop.f32.mrf.mxu3 }
  0xab   :  { %v271_v63 = vpop.f32.mrf.mxu0  ;;  %v291_v0 = vpop.f32.mrf.mxu1  ;;  %v462_v9 = vadd.f32 %v873_v20, %v309_v61  ;;  %v470_v10 = vadd.f32 %v873_v20, %v329_v62 }
  0xac   :  { %v447_v3 = vadd.f32 %v873_v20, %v271_v63  ;;  %v455_v4 = vadd.f32 %v873_v20, %v291_v0 }
  0xae   :  { %v665_v5 = vpack.c.bf16 %v447_v3, %v446_v1  ;;  %v685_v6 = vpack.c.bf16 %v455_v4, %v454_v2 }
  0xb0   :  { %733 = vst [vmem:[#allocation3 + $0x10] sm:$0xff] %v665_v5  }
  0xb1   :  { %737 = vst [vmem:[#allocation3 + $0x30] sm:$0xff] %v685_v6  }
  0xb2   :  { %v311_v7 = vpop.f32.mrf.mxu2  ;;  %v331_v8 = vpop.f32.mrf.mxu3 }
  0xb3   :  { %v463_v11 = vadd.f32 %v873_v20, %v311_v7  ;;  %v471_v12 = vadd.f32 %v873_v20, %v331_v8  ;;  %v274_v13 = vpop.f32.mrf.mxu0  ;;  %v294_v14 = vpop.f32.mrf.mxu1 }
  0xb4   :  { %v448_v22 = vadd.f32 %v873_v20, %v274_v13  ;;  %v456_v23 = vadd.f32 %v873_v20, %v294_v14 }
  0xb5   :  { %v705_v15 = vpack.c.bf16 %v463_v11, %v462_v9  ;;  %v725_v16 = vpack.c.bf16 %v471_v12, %v470_v10 }
  0xb7   :  { %741 = vst [vmem:[#allocation3 + $0x50] sm:$0xff] %v705_v15  }
  0xb8   :  { %745 = vst [vmem:[#allocation3 + $0x70] sm:$0xff] %v725_v16  }
  0xba   :  { %v314_v17 = vpop.f32.mrf.mxu2  ;;  %v334_v18 = vpop.f32.mrf.mxu3 }
  0xbb   :  { %v276_v19 = vpop.f32.mrf.mxu0  ;;  %v296_v21 = vpop.f32.mrf.mxu1  ;;  %v464_v30 = vadd.f32 %v873_v20, %v314_v17  ;;  %v472_v31 = vadd.f32 %v873_v20, %v334_v18 }
  0xbc   :  { %v449_v24 = vadd.f32 %v873_v20, %v276_v19  ;;  %v457_v25 = vadd.f32 %v873_v20, %v296_v21 }
  0xbe   :  { %v670_v26 = vpack.c.bf16 %v449_v24, %v448_v22  ;;  %v690_v27 = vpack.c.bf16 %v457_v25, %v456_v23 }
  0xc0   :  { %734 = vst [vmem:[#allocation3 + $0x18] sm:$0xff] %v670_v26  }
  0xc1   :  { %738 = vst [vmem:[#allocation3 + $0x38] sm:$0xff] %v690_v27  }
  0xc2   :  { %v316_v28 = vpop.f32.mrf.mxu2  ;;  %v336_v29 = vpop.f32.mrf.mxu3 }
  0xc3   :  { %v465_v32 = vadd.f32 %v873_v20, %v316_v28  ;;  %v473_v33 = vadd.f32 %v873_v20, %v336_v29 }
  0xc5   :  { %v710_v34 = vpack.c.bf16 %v465_v32, %v464_v30  ;;  %v730_v35 = vpack.c.bf16 %v473_v33, %v472_v31 }
  0xc7   :  { %742 = vst [vmem:[#allocation3 + $0x58] sm:$0xff] %v710_v34  }
  0xc8   :  { %746 = vst [vmem:[#allocation3 + $0x78] sm:$0xff] %v730_v35  }
  0xc9   :  { %550 = dma.vmem_to_hbm [thread:$0]  %s543_s2, 2048, %s545_s1, [#allocation4], %s781_s22, %s781_s22, %s782_s23  }
  0xca   :  { %778 = dma.done.wait [#allocation4], 2048  }
  0xcb   :  { %779 = vsyncadd [#allocation4], 4294965248 }
  0xcc   :  { %555 = vsyncpa [#allocation4], 1 }

</bundles_post_ra>
